<compile_context>
chip_gen: v7x
topology: tpu7x:2x2x1
jax: 0.10.0
libtpu: 0.0.40
codegen_flags: <defaults>
</compile_context>

<pallas_src>
from functools import partial

import jax
import jax.numpy as jnp
from jax import lax
from jax.experimental import pallas as pl
from jax.experimental.pallas import tpu as pltpu


def _gaussian_conv2d_kernel(x_ref, w_ref, m_ref, o_ref, xs_ref, col_ref,
                            *, K, W, pad, data_off):
    # x_ref  : (Bn, C, H*W)      batch block, flattened spatial (lane-dense)
    # w_ref  : (O, K*K*C)        flat conv weight, columns ordered (dy, dx, c)
    # m_ref  : (K, H*W)          per-dx column masks (1.0 valid / 0.0 row-wraparound)
    # o_ref  : (Bn, O, H*W)      output block (NCHW order, flattened spatial)
    # xs_ref : (C, L)            zero-bordered flat padded image (reused across b)
    # col_ref: (K*K*C, Bn*H*W)   im2col scratch, rows ordered (dy, dx, c)
    Bn, C, HW = x_ref.shape
    halo = pad * W + pad

    # Zero only the lanes the shifted slices can actually read (left/right halos).
    # Runs every step: under megacore sharding each core owns a private scratch,
    # so this must NOT be hidden behind @pl.when(program_id == 0).
    if halo > 0:
        xs_ref[:, data_off - halo:data_off] = jnp.zeros((C, halo), dtype=xs_ref.dtype)
        xs_ref[:, data_off + HW:data_off + HW + halo] = jnp.zeros(
            (C, halo), dtype=xs_ref.dtype)

    # Build the im2col for every batch element of this block (static unroll).
    for b in range(Bn):
        xs_ref[:, data_off:data_off + HW] = x_ref[b]           # lane-aligned interior copy
        for dy in range(K):
            for dx in range(K):
                s = data_off + (dy - pad) * W + (dx - pad)
                patch = xs_ref[:, s:s + HW]                     # (C, HW) contiguous slice
                if dx != pad:
                    # kill columns whose flat index wrapped across a row boundary;
                    # fused into the im2col store (no standalone masked copy)
                    patch = patch * m_ref[dx:dx + 1, :]
                tap = dy * K + dx
                col_ref[tap * C:(tap + 1) * C, b * HW:(b + 1) * HW] = patch

    # One MXU matmul for the whole block: (O, K*K*C) @ (K*K*C, Bn*HW).
    out = jnp.dot(w_ref[...], col_ref[...], preferred_element_type=jnp.float32)

    # Lane-dense unmasked stores; o_ref written exactly once per batch element.
    for b in range(Bn):
        o_ref[b] = out[:, b * HW:(b + 1) * HW].astype(o_ref.dtype)


def _choose_batch_block(N, C, O, HW, K, itemsize):
    """Pick Bn (batch elements per grid step): large enough for MiB-scale per-step
    DMAs, small enough to fit the default scoped-VMEM budget and keep the matmul
    result comfortably register-resident."""
    # Approx per-batch-element VMEM cost of a step (double-buffered I/O + im2col rows).
    per_b = (2 * C * HW + 2 * O * HW + K * K * C * HW) * itemsize
    vmem_budget = 20 * 1024 * 1024                 # headroom under the 32 MiB default
    max_bn = max(1, vmem_budget // max(per_b, 1))
    # Keep the (O, Bn*HW) f32 matmul result inside the vreg file (no spills).
    vreg_budget = 128 * 1024
    max_bn = min(max_bn, max(1, vreg_budget // max(O * HW * 4, 1)))
    target_in_bytes = 1 << 20                      # aim for >= ~1 MiB of input per step
    bn = 1
    for d in range(1, N + 1):
        if N % d != 0 or d > max_bn:
            continue
        bn = d
        if d * C * HW * itemsize >= target_in_bytes:
            break                                  # keep the grid long once DMAs are big
    return bn


def gaussian_conv2d(x_nchw, A, sigma_param, kernel_size):
    """Forward pass matching the PyTorch GaussianConv2D module.

    x_nchw: (N, C_in, H, W); A, sigma_param: (C_out, C_in, 1, 1)
    returns: (N, C_out, H, W)
    """
    assert kernel_size % 2 == 1, "Kernel size must be an odd number."
    N, C, H, W = x_nchw.shape
    O = A.shape[0]
    K = kernel_size
    pad = K // 2
    HW = H * W
    KKC = K * K * C

    # ---- parameter glue (tiny, plain JAX, computed in f32) ----
    coords = (jnp.arange(K, dtype=jnp.float32) - pad).reshape(1, 1, 1, K)
    sigma = jnp.maximum(sigma_param.astype(jnp.float32), 0.001)          # clamp(min=0.001)
    weight_1d = A.astype(jnp.float32) * jnp.exp(-coords ** 2 / (2.0 * sigma ** 2))
    kernel_2d = jnp.matmul(jnp.swapaxes(weight_1d, -1, -2), weight_1d)   # (O, C, K, K)
    # flat (O, K*K*C) weight, columns ordered (dy, dx, c) == im2col row order
    w_flat = jnp.transpose(kernel_2d, (0, 2, 3, 1)).reshape(O, KKC).astype(x_nchw.dtype)

    # per-dx lane masks killing row-wraparound columns of the flat padded image
    xcol = jnp.arange(HW, dtype=jnp.int32) % W
    shift = xcol[None, :] + (jnp.arange(K, dtype=jnp.int32) - pad)[:, None]
    masks = ((shift >= 0) & (shift < W)).astype(x_nchw.dtype)            # (K, HW)

    # flat padded scratch: image interior at a lane-aligned offset, with exactly the
    # halo (pad*W + pad lanes) readable on each side.
    halo = pad * W + pad
    data_off = ((halo + 127) // 128) * 128 if halo > 0 else 0
    L = max(data_off + HW + halo, 128)

    itemsize = jnp.dtype(x_nchw.dtype).itemsize
    Bn = _choose_batch_block(N, C, O, HW, K, itemsize)
    grid_n = N // Bn

    x_flat = x_nchw.reshape(N, C, HW)        # free contiguous reshape, stays NCHW order

    kernel_fn = partial(_gaussian_conv2d_kernel, K=K, W=W, pad=pad, data_off=data_off)

    # VMEM estimate; raise the scoped limit only when the default would not fit,
    # and never past v7x's 64 MiB physical VMEM.
    vmem_bytes = (2 * Bn * C * HW + 2 * Bn * O * HW + C * L + KKC * Bn * HW
                  + O * KKC + K * HW) * itemsize
    cp_kwargs = dict(dimension_semantics=("parallel",))
    if vmem_bytes > 24 * 1024 * 1024:
        cp_kwargs["vmem_limit_bytes"] = int(min(2 * vmem_bytes, 60 * 1024 * 1024))

    out_flat = pl.pallas_call(
        kernel_fn,
        out_shape=jax.ShapeDtypeStruct((N, O, HW), x_nchw.dtype),
        grid_spec=pltpu.PrefetchScalarGridSpec(
            num_scalar_prefetch=0,
            grid=(grid_n,),
            in_specs=[
                pl.BlockSpec((Bn, C, HW), lambda n: (n, 0, 0)),
                pl.BlockSpec((O, KKC), lambda n: (0, 0)),
                pl.BlockSpec((K, HW), lambda n: (0, 0)),
            ],
            out_specs=pl.BlockSpec((Bn, O, HW), lambda n: (n, 0, 0)),
            scratch_shapes=[
                pltpu.VMEM((C, L), x_nchw.dtype),            # zero-bordered flat image
                pltpu.VMEM((KKC, Bn * HW), x_nchw.dtype),     # im2col
            ],
        ),
        compiler_params=pltpu.CompilerParams(**cp_kwargs),
    )(x_flat, w_flat, masks)

    # free contiguous reshape back to (N, O, H, W) -- already NCHW ordered
    return out_flat.reshape(N, O, H, W)


def _reference(x_nchw, A, sigma_param, kernel_size):
    """Pure-JAX reference (mirrors F.conv2d with padding=K//2)."""
    K = kernel_size
    pad = K // 2
    coords = (jnp.arange(K, dtype=jnp.float32) - pad).reshape(1, 1, 1, K)
    sigma = jnp.maximum(sigma_param.astype(jnp.float32), 0.001)
    weight_1d = A.astype(jnp.float32) * jnp.exp(-coords ** 2 / (2.0 * sigma ** 2))
    kernel_2d = jnp.matmul(jnp.swapaxes(weight_1d, -1, -2), weight_1d).astype(x_nchw.dtype)
    return lax.conv_general_dilated(
        x_nchw, kernel_2d, window_strides=(1, 1),
        padding=[(pad, pad), (pad, pad)],
        dimension_numbers=("NCHW", "OIHW", "NCHW"))


if __name__ == "__main__":
    in_channels, out_channels, kernel_size = 4, 8, 3
    N, H, W = 2, 16, 16

    key = jax.random.PRNGKey(0)
    k_a, k_s, k_x = jax.random.split(key, 3)

    # Deterministic parameter init mirroring the module's __init__:
    #   A     = 1 + randn(O, I, 1, 1)
    #   sigma = (K // 2) + randn(O, I, 1, 1)
    A = 1.0 + jax.random.normal(k_a, (out_channels, in_channels, 1, 1), dtype=jnp.float32)
    sigma_param = (kernel_size // 2) + jax.random.normal(
        k_s, (out_channels, in_channels, 1, 1), dtype=jnp.float32)
    x = jax.random.normal(k_x, (N, in_channels, H, W), dtype=jnp.float32)

    out = jax.block_until_ready(gaussian_conv2d(x, A, sigma_param, kernel_size))

    ref = jax.block_until_ready(_reference(x, A, sigma_param, kernel_size))
    assert out.shape == (N, out_channels, H, W)
    assert jnp.allclose(out, ref, atol=1e-4, rtol=1e-4), "mismatch vs reference"

    print("KERNEL_OK")
</pallas_src>

<mosaic_0001>
module attributes {stable_mosaic.version = 11 : i64} {
  func.func @_gaussian_conv2d_kernel(%arg0: i32, %arg1: memref<2x4x256xf32, #tpu.memory_space<vmem>>, %arg2: memref<8x36xf32, #tpu.memory_space<vmem>>, %arg3: memref<3x256xf32, #tpu.memory_space<vmem>>, %arg4: memref<2x8x256xf32, #tpu.memory_space<vmem>>, %arg5: memref<4x401xf32, #tpu.memory_space<vmem>>, %arg6: memref<36x512xf32, #tpu.memory_space<vmem>>) attributes {dimension_semantics = [#tpu.dimension_semantics<parallel>], iteration_bounds = array<i64: 1>, scalar_prefetch = 0 : i64, scratch_operands = 2 : i64, tpu.core_type = #tpu.core_type<tc>, window_params = [{transform_indices = @transform_0, window_bounds = array<i64: 2, 4, 256>}, {pipeline_mode = #tpu.pipeline_mode<synchronous>, transform_indices = @transform_1, window_bounds = array<i64: 8, 36>}, {pipeline_mode = #tpu.pipeline_mode<synchronous>, transform_indices = @transform_2, window_bounds = array<i64: 3, 256>}, {transform_indices = @transform_3, window_bounds = array<i64: 2, 8, 256>}]} {
    %cst = arith.constant 0.000000e+00 : f32
    %0 = vector.broadcast %cst : f32 to vector<4x17xf32>
    %c0 = arith.constant 0 : index
    %c111 = arith.constant 111 : index
    %1 = vector.load %arg5[%c0, %c111] : memref<4x401xf32, #tpu.memory_space<vmem>>, vector<4x17xf32>
    tpu.vector_store %arg5[%c0, %c111], %0 {strides = array<i32>} : memref<4x401xf32, #tpu.memory_space<vmem>>, vector<4x17xf32>,
    %cst_0 = arith.constant 0.000000e+00 : f32
    %2 = vector.broadcast %cst_0 : f32 to vector<4x17xf32>
    %c0_1 = arith.constant 0 : index
    %c384 = arith.constant 384 : index
    %3 = vector.load %arg5[%c0_1, %c384] : memref<4x401xf32, #tpu.memory_space<vmem>>, vector<4x17xf32>
    tpu.vector_store %arg5[%c0_1, %c384], %2 {strides = array<i32>} : memref<4x401xf32, #tpu.memory_space<vmem>>, vector<4x17xf32>,
    %c0_2 = arith.constant 0 : index
    %c0_3 = arith.constant 0 : index
    %c0_4 = arith.constant 0 : index
    %4 = vector.load %arg1[%c0_2, %c0_3, %c0_4] : memref<2x4x256xf32, #tpu.memory_space<vmem>>, vector<1x4x256xf32>
    %5 = vector.shape_cast %4 : vector<1x4x256xf32> to vector<4x256xf32>
    %c0_5 = arith.constant 0 : index
    %c128 = arith.constant 128 : index
    %6 = vector.load %arg5[%c0_5, %c128] : memref<4x401xf32, #tpu.memory_space<vmem>>, vector<4x256xf32>
    tpu.vector_store %arg5[%c0_5, %c128], %5 {strides = array<i32>} : memref<4x401xf32, #tpu.memory_space<vmem>>, vector<4x256xf32>,
    %c0_6 = arith.constant 0 : index
    %c111_7 = arith.constant 111 : index
    %7 = vector.load %arg5[%c0_6, %c111_7] : memref<4x401xf32, #tpu.memory_space<vmem>>, vector<4x256xf32>
    %c0_8 = arith.constant 0 : index
    %c0_9 = arith.constant 0 : index
    %8 = vector.load %arg3[%c0_8, %c0_9] : memref<3x256xf32, #tpu.memory_space<vmem>>, vector<1x256xf32>
    %9 = vector.broadcast %8 : vector<1x256xf32> to vector<4x256xf32>
    %10 = arith.mulf %7, %9 : vector<4x256xf32>
    %c0_10 = arith.constant 0 : index
    %c0_11 = arith.constant 0 : index
    %11 = vector.load %arg6[%c0_10, %c0_11] : memref<36x512xf32, #tpu.memory_space<vmem>>, vector<4x256xf32>
    tpu.vector_store %arg6[%c0_10, %c0_11], %10 {strides = array<i32>} : memref<36x512xf32, #tpu.memory_space<vmem>>, vector<4x256xf32>,
    %c0_12 = arith.constant 0 : index
    %c112 = arith.constant 112 : index
    %12 = vector.load %arg5[%c0_12, %c112] : memref<4x401xf32, #tpu.memory_space<vmem>>, vector<4x256xf32>
    %c4 = arith.constant 4 : index
    %c0_13 = arith.constant 0 : index
    %13 = vector.load %arg6[%c4, %c0_13] : memref<36x512xf32, #tpu.memory_space<vmem>>, vector<4x256xf32>
    tpu.vector_store %arg6[%c4, %c0_13], %12 {strides = array<i32>} : memref<36x512xf32, #tpu.memory_space<vmem>>, vector<4x256xf32>,
    %c0_14 = arith.constant 0 : index
    %c113 = arith.constant 113 : index
    %14 = vector.load %arg5[%c0_14, %c113] : memref<4x401xf32, #tpu.memory_space<vmem>>, vector<4x256xf32>
    %c2 = arith.constant 2 : index
    %c0_15 = arith.constant 0 : index
    %15 = vector.load %arg3[%c2, %c0_15] : memref<3x256xf32, #tpu.memory_space<vmem>>, vector<1x256xf32>
    %16 = vector.broadcast %15 : vector<1x256xf32> to vector<4x256xf32>
    %17 = arith.mulf %14, %16 : vector<4x256xf32>
    %c8 = arith.constant 8 : index
    %c0_16 = arith.constant 0 : index
    %18 = vector.load %arg6[%c8, %c0_16] : memref<36x512xf32, #tpu.memory_space<vmem>>, vector<4x256xf32>
    tpu.vector_store %arg6[%c8, %c0_16], %17 {strides = array<i32>} : memref<36x512xf32, #tpu.memory_space<vmem>>, vector<4x256xf32>,
    %c0_17 = arith.constant 0 : index
    %c127 = arith.constant 127 : index
    %19 = vector.load %arg5[%c0_17, %c127] : memref<4x401xf32, #tpu.memory_space<vmem>>, vector<4x256xf32>
    %c0_18 = arith.constant 0 : index
    %c0_19 = arith.constant 0 : index
    %20 = vector.load %arg3[%c0_18, %c0_19] : memref<3x256xf32, #tpu.memory_space<vmem>>, vector<1x256xf32>
    %21 = vector.broadcast %20 : vector<1x256xf32> to vector<4x256xf32>
    %22 = arith.mulf %19, %21 : vector<4x256xf32>
    %c12 = arith.constant 12 : index
    %c0_20 = arith.constant 0 : index
    %23 = vector.load %arg6[%c12, %c0_20] : memref<36x512xf32, #tpu.memory_space<vmem>>, vector<4x256xf32>
    tpu.vector_store %arg6[%c12, %c0_20], %22 {strides = array<i32>} : memref<36x512xf32, #tpu.memory_space<vmem>>, vector<4x256xf32>,
    %c0_21 = arith.constant 0 : index
    %c128_22 = arith.constant 128 : index
    %24 = vector.load %arg5[%c0_21, %c128_22] : memref<4x401xf32, #tpu.memory_space<vmem>>, vector<4x256xf32>
    %c16 = arith.constant 16 : index
    %c0_23 = arith.constant 0 : index
    %25 = vector.load %arg6[%c16, %c0_23] : memref<36x512xf32, #tpu.memory_space<vmem>>, vector<4x256xf32>
    tpu.vector_store %arg6[%c16, %c0_23], %24 {strides = array<i32>} : memref<36x512xf32, #tpu.memory_space<vmem>>, vector<4x256xf32>,
    %c0_24 = arith.constant 0 : index
    %c129 = arith.constant 129 : index
    %26 = vector.load %arg5[%c0_24, %c129] : memref<4x401xf32, #tpu.memory_space<vmem>>, vector<4x256xf32>
    %c2_25 = arith.constant 2 : index
    %c0_26 = arith.constant 0 : index
    %27 = vector.load %arg3[%c2_25, %c0_26] : memref<3x256xf32, #tpu.memory_space<vmem>>, vector<1x256xf32>
    %28 = vector.broadcast %27 : vector<1x256xf32> to vector<4x256xf32>
    %29 = arith.mulf %26, %28 : vector<4x256xf32>
    %c20 = arith.constant 20 : index
    %c0_27 = arith.constant 0 : index
    %30 = vector.load %arg6[%c20, %c0_27] : memref<36x512xf32, #tpu.memory_space<vmem>>, vector<4x256xf32>
    tpu.vector_store %arg6[%c20, %c0_27], %29 {strides = array<i32>} : memref<36x512xf32, #tpu.memory_space<vmem>>, vector<4x256xf32>,
    %c0_28 = arith.constant 0 : index
    %c143 = arith.constant 143 : index
    %31 = vector.load %arg5[%c0_28, %c143] : memref<4x401xf32, #tpu.memory_space<vmem>>, vector<4x256xf32>
    %c0_29 = arith.constant 0 : index
    %c0_30 = arith.constant 0 : index
    %32 = vector.load %arg3[%c0_29, %c0_30] : memref<3x256xf32, #tpu.memory_space<vmem>>, vector<1x256xf32>
    %33 = vector.broadcast %32 : vector<1x256xf32> to vector<4x256xf32>
    %34 = arith.mulf %31, %33 : vector<4x256xf32>
    %c24 = arith.constant 24 : index
    %c0_31 = arith.constant 0 : index
    %35 = vector.load %arg6[%c24, %c0_31] : memref<36x512xf32, #tpu.memory_space<vmem>>, vector<4x256xf32>
    tpu.vector_store %arg6[%c24, %c0_31], %34 {strides = array<i32>} : memref<36x512xf32, #tpu.memory_space<vmem>>, vector<4x256xf32>,
    %c0_32 = arith.constant 0 : index
    %c144 = arith.constant 144 : index
    %36 = vector.load %arg5[%c0_32, %c144] : memref<4x401xf32, #tpu.memory_space<vmem>>, vector<4x256xf32>
    %c28 = arith.constant 28 : index
    %c0_33 = arith.constant 0 : index
    %37 = vector.load %arg6[%c28, %c0_33] : memref<36x512xf32, #tpu.memory_space<vmem>>, vector<4x256xf32>
    tpu.vector_store %arg6[%c28, %c0_33], %36 {strides = array<i32>} : memref<36x512xf32, #tpu.memory_space<vmem>>, vector<4x256xf32>,
    %c0_34 = arith.constant 0 : index
    %c145 = arith.constant 145 : index
    %38 = vector.load %arg5[%c0_34, %c145] : memref<4x401xf32, #tpu.memory_space<vmem>>, vector<4x256xf32>
    %c2_35 = arith.constant 2 : index
    %c0_36 = arith.constant 0 : index
    %39 = vector.load %arg3[%c2_35, %c0_36] : memref<3x256xf32, #tpu.memory_space<vmem>>, vector<1x256xf32>
    %40 = vector.broadcast %39 : vector<1x256xf32> to vector<4x256xf32>
    %41 = arith.mulf %38, %40 : vector<4x256xf32>
    %c32 = arith.constant 32 : index
    %c0_37 = arith.constant 0 : index
    %42 = vector.load %arg6[%c32, %c0_37] : memref<36x512xf32, #tpu.memory_space<vmem>>, vector<4x256xf32>
    tpu.vector_store %arg6[%c32, %c0_37], %41 {strides = array<i32>} : memref<36x512xf32, #tpu.memory_space<vmem>>, vector<4x256xf32>,
    %c1 = arith.constant 1 : index
    %c0_38 = arith.constant 0 : index
    %c0_39 = arith.constant 0 : index
    %43 = vector.load %arg1[%c1, %c0_38, %c0_39] : memref<2x4x256xf32, #tpu.memory_space<vmem>>, vector<1x4x256xf32>
    %44 = vector.shape_cast %43 : vector<1x4x256xf32> to vector<4x256xf32>
    %c0_40 = arith.constant 0 : index
    %c128_41 = arith.constant 128 : index
    %45 = vector.load %arg5[%c0_40, %c128_41] : memref<4x401xf32, #tpu.memory_space<vmem>>, vector<4x256xf32>
    tpu.vector_store %arg5[%c0_40, %c128_41], %44 {strides = array<i32>} : memref<4x401xf32, #tpu.memory_space<vmem>>, vector<4x256xf32>,
    %c0_42 = arith.constant 0 : index
    %c111_43 = arith.constant 111 : index
    %46 = vector.load %arg5[%c0_42, %c111_43] : memref<4x401xf32, #tpu.memory_space<vmem>>, vector<4x256xf32>
    %c0_44 = arith.constant 0 : index
    %c0_45 = arith.constant 0 : index
    %47 = vector.load %arg3[%c0_44, %c0_45] : memref<3x256xf32, #tpu.memory_space<vmem>>, vector<1x256xf32>
    %48 = vector.broadcast %47 : vector<1x256xf32> to vector<4x256xf32>
    %49 = arith.mulf %46, %48 : vector<4x256xf32>
    %c0_46 = arith.constant 0 : index
    %c256 = arith.constant 256 : index
    %50 = vector.load %arg6[%c0_46, %c256] : memref<36x512xf32, #tpu.memory_space<vmem>>, vector<4x256xf32>
    tpu.vector_store %arg6[%c0_46, %c256], %49 {strides = array<i32>} : memref<36x512xf32, #tpu.memory_space<vmem>>, vector<4x256xf32>,
    %c0_47 = arith.constant 0 : index
    %c112_48 = arith.constant 112 : index
    %51 = vector.load %arg5[%c0_47, %c112_48] : memref<4x401xf32, #tpu.memory_space<vmem>>, vector<4x256xf32>
    %c4_49 = arith.constant 4 : index
    %c256_50 = arith.constant 256 : index
    %52 = vector.load %arg6[%c4_49, %c256_50] : memref<36x512xf32, #tpu.memory_space<vmem>>, vector<4x256xf32>
    tpu.vector_store %arg6[%c4_49, %c256_50], %51 {strides = array<i32>} : memref<36x512xf32, #tpu.memory_space<vmem>>, vector<4x256xf32>,
    %c0_51 = arith.constant 0 : index
    %c113_52 = arith.constant 113 : index
    %53 = vector.load %arg5[%c0_51, %c113_52] : memref<4x401xf32, #tpu.memory_space<vmem>>, vector<4x256xf32>
    %c2_53 = arith.constant 2 : index
    %c0_54 = arith.constant 0 : index
    %54 = vector.load %arg3[%c2_53, %c0_54] : memref<3x256xf32, #tpu.memory_space<vmem>>, vector<1x256xf32>
    %55 = vector.broadcast %54 : vector<1x256xf32> to vector<4x256xf32>
    %56 = arith.mulf %53, %55 : vector<4x256xf32>
    %c8_55 = arith.constant 8 : index
    %c256_56 = arith.constant 256 : index
    %57 = vector.load %arg6[%c8_55, %c256_56] : memref<36x512xf32, #tpu.memory_space<vmem>>, vector<4x256xf32>
    tpu.vector_store %arg6[%c8_55, %c256_56], %56 {strides = array<i32>} : memref<36x512xf32, #tpu.memory_space<vmem>>, vector<4x256xf32>,
    %c0_57 = arith.constant 0 : index
    %c127_58 = arith.constant 127 : index
    %58 = vector.load %arg5[%c0_57, %c127_58] : memref<4x401xf32, #tpu.memory_space<vmem>>, vector<4x256xf32>
    %c0_59 = arith.constant 0 : index
    %c0_60 = arith.constant 0 : index
    %59 = vector.load %arg3[%c0_59, %c0_60] : memref<3x256xf32, #tpu.memory_space<vmem>>, vector<1x256xf32>
    %60 = vector.broadcast %59 : vector<1x256xf32> to vector<4x256xf32>
    %61 = arith.mulf %58, %60 : vector<4x256xf32>
    %c12_61 = arith.constant 12 : index
    %c256_62 = arith.constant 256 : index
    %62 = vector.load %arg6[%c12_61, %c256_62] : memref<36x512xf32, #tpu.memory_space<vmem>>, vector<4x256xf32>
    tpu.vector_store %arg6[%c12_61, %c256_62], %61 {strides = array<i32>} : memref<36x512xf32, #tpu.memory_space<vmem>>, vector<4x256xf32>,
    %c0_63 = arith.constant 0 : index
    %c128_64 = arith.constant 128 : index
    %63 = vector.load %arg5[%c0_63, %c128_64] : memref<4x401xf32, #tpu.memory_space<vmem>>, vector<4x256xf32>
    %c16_65 = arith.constant 16 : index
    %c256_66 = arith.constant 256 : index
    %64 = vector.load %arg6[%c16_65, %c256_66] : memref<36x512xf32, #tpu.memory_space<vmem>>, vector<4x256xf32>
    tpu.vector_store %arg6[%c16_65, %c256_66], %63 {strides = array<i32>} : memref<36x512xf32, #tpu.memory_space<vmem>>, vector<4x256xf32>,
    %c0_67 = arith.constant 0 : index
    %c129_68 = arith.constant 129 : index
    %65 = vector.load %arg5[%c0_67, %c129_68] : memref<4x401xf32, #tpu.memory_space<vmem>>, vector<4x256xf32>
    %c2_69 = arith.constant 2 : index
    %c0_70 = arith.constant 0 : index
    %66 = vector.load %arg3[%c2_69, %c0_70] : memref<3x256xf32, #tpu.memory_space<vmem>>, vector<1x256xf32>
    %67 = vector.broadcast %66 : vector<1x256xf32> to vector<4x256xf32>
    %68 = arith.mulf %65, %67 : vector<4x256xf32>
    %c20_71 = arith.constant 20 : index
    %c256_72 = arith.constant 256 : index
    %69 = vector.load %arg6[%c20_71, %c256_72] : memref<36x512xf32, #tpu.memory_space<vmem>>, vector<4x256xf32>
    tpu.vector_store %arg6[%c20_71, %c256_72], %68 {strides = array<i32>} : memref<36x512xf32, #tpu.memory_space<vmem>>, vector<4x256xf32>,
    %c0_73 = arith.constant 0 : index
    %c143_74 = arith.constant 143 : index
    %70 = vector.load %arg5[%c0_73, %c143_74] : memref<4x401xf32, #tpu.memory_space<vmem>>, vector<4x256xf32>
    %c0_75 = arith.constant 0 : index
    %c0_76 = arith.constant 0 : index
    %71 = vector.load %arg3[%c0_75, %c0_76] : memref<3x256xf32, #tpu.memory_space<vmem>>, vector<1x256xf32>
    %72 = vector.broadcast %71 : vector<1x256xf32> to vector<4x256xf32>
    %73 = arith.mulf %70, %72 : vector<4x256xf32>
    %c24_77 = arith.constant 24 : index
    %c256_78 = arith.constant 256 : index
    %74 = vector.load %arg6[%c24_77, %c256_78] : memref<36x512xf32, #tpu.memory_space<vmem>>, vector<4x256xf32>
    tpu.vector_store %arg6[%c24_77, %c256_78], %73 {strides = array<i32>} : memref<36x512xf32, #tpu.memory_space<vmem>>, vector<4x256xf32>,
    %c0_79 = arith.constant 0 : index
    %c144_80 = arith.constant 144 : index
    %75 = vector.load %arg5[%c0_79, %c144_80] : memref<4x401xf32, #tpu.memory_space<vmem>>, vector<4x256xf32>
    %c28_81 = arith.constant 28 : index
    %c256_82 = arith.constant 256 : index
    %76 = vector.load %arg6[%c28_81, %c256_82] : memref<36x512xf32, #tpu.memory_space<vmem>>, vector<4x256xf32>
    tpu.vector_store %arg6[%c28_81, %c256_82], %75 {strides = array<i32>} : memref<36x512xf32, #tpu.memory_space<vmem>>, vector<4x256xf32>,
    %c0_83 = arith.constant 0 : index
    %c145_84 = arith.constant 145 : index
    %77 = vector.load %arg5[%c0_83, %c145_84] : memref<4x401xf32, #tpu.memory_space<vmem>>, vector<4x256xf32>
    %c2_85 = arith.constant 2 : index
    %c0_86 = arith.constant 0 : index
    %78 = vector.load %arg3[%c2_85, %c0_86] : memref<3x256xf32, #tpu.memory_space<vmem>>, vector<1x256xf32>
    %79 = vector.broadcast %78 : vector<1x256xf32> to vector<4x256xf32>
    %80 = arith.mulf %77, %79 : vector<4x256xf32>
    %c32_87 = arith.constant 32 : index
    %c256_88 = arith.constant 256 : index
    %81 = vector.load %arg6[%c32_87, %c256_88] : memref<36x512xf32, #tpu.memory_space<vmem>>, vector<4x256xf32>
    tpu.vector_store %arg6[%c32_87, %c256_88], %80 {strides = array<i32>} : memref<36x512xf32, #tpu.memory_space<vmem>>, vector<4x256xf32>,
    %c0_89 = arith.constant 0 : index
    %c0_90 = arith.constant 0 : index
    %82 = vector.load %arg2[%c0_89, %c0_90] : memref<8x36xf32, #tpu.memory_space<vmem>>, vector<8x36xf32>
    %c0_91 = arith.constant 0 : index
    %c0_92 = arith.constant 0 : index
    %83 = vector.load %arg6[%c0_91, %c0_92] : memref<36x512xf32, #tpu.memory_space<vmem>>, vector<36x512xf32>
    %cst_93 = arith.constant dense<0.000000e+00> : vector<8x512xf32>
    %84 = tpu.matmul %82, %83, %cst_93 {dimension_numbers = #tpu.dot_dimension_numbers<[1], [0], [0], [1], [0, 0, 1, 1], [], []>} : vector<8x36xf32>, vector<36x512xf32>, vector<8x512xf32> -> vector<8x512xf32>
    %85 = vector.extract_strided_slice %84 {offsets = [0, 0], sizes = [8, 256], strides = [1, 1]} : vector<8x512xf32> to vector<8x256xf32>
    %c0_94 = arith.constant 0 : index
    %c0_95 = arith.constant 0 : index
    %c0_96 = arith.constant 0 : index
    %86 = vector.load %arg4[%c0_94, %c0_95, %c0_96] : memref<2x8x256xf32, #tpu.memory_space<vmem>>, vector<1x8x256xf32>
    %87 = vector.shape_cast %86 : vector<1x8x256xf32> to vector<8x256xf32>
    %88 = vector.shape_cast %85 : vector<8x256xf32> to vector<1x8x256xf32>
    tpu.vector_store %arg4[%c0_94, %c0_95, %c0_96], %88 {strides = array<i32>} : memref<2x8x256xf32, #tpu.memory_space<vmem>>, vector<1x8x256xf32>,
    %89 = vector.extract_strided_slice %84 {offsets = [0, 256], sizes = [8, 256], strides = [1, 1]} : vector<8x512xf32> to vector<8x256xf32>
    %c1_97 = arith.constant 1 : index
    %c0_98 = arith.constant 0 : index
    %c0_99 = arith.constant 0 : index
    %90 = vector.load %arg4[%c1_97, %c0_98, %c0_99] : memref<2x8x256xf32, #tpu.memory_space<vmem>>, vector<1x8x256xf32>
    %91 = vector.shape_cast %90 : vector<1x8x256xf32> to vector<8x256xf32>
    %92 = vector.shape_cast %89 : vector<8x256xf32> to vector<1x8x256xf32>
    tpu.vector_store %arg4[%c1_97, %c0_98, %c0_99], %92 {strides = array<i32>} : memref<2x8x256xf32, #tpu.memory_space<vmem>>, vector<1x8x256xf32>,
    return
  }
  func.func @transform_0(%arg0: i32) -> (i32, i32, i32) {
    %c0_i32 = arith.constant 0 : i32
    %c0_i32_0 = arith.constant 0 : i32
    %c0_i32_1 = arith.constant 0 : i32
    return %arg0, %c0_i32, %c0_i32_0 : i32, i32, i32
  }
  func.func @transform_1(%arg0: i32) -> (i32, i32) {
    %c0_i32 = arith.constant 0 : i32
    %c0_i32_0 = arith.constant 0 : i32
    %c0_i32_1 = arith.constant 0 : i32
    return %c0_i32, %c0_i32_0 : i32, i32
  }
  func.func @transform_2(%arg0: i32) -> (i32, i32) {
    %c0_i32 = arith.constant 0 : i32
    %c0_i32_0 = arith.constant 0 : i32
    %c0_i32_1 = arith.constant 0 : i32
    return %c0_i32, %c0_i32_0 : i32, i32
  }
  func.func @transform_3(%arg0: i32) -> (i32, i32, i32) {
    %c0_i32 = arith.constant 0 : i32
    %c0_i32_0 = arith.constant 0 : i32
    %c0_i32_1 = arith.constant 0 : i32
    return %arg0, %c0_i32, %c0_i32_0 : i32, i32, i32
  }
}

</mosaic_0001>

<bundles_post_ra>
// kernel: tpu_custom_call.1
= control target key start
LH: loop header
LB: loop body
LE: loop exit
PB: predicated region body
PF: predicated region fallthrough
CT: control target
= control target key end

     0   :  { %8 = vsyncpa [#allocation5], 0  ;;  %s1281_s0 = inlined_call_operand.hbm [shape: f32[2,4,256], index: 0, kind: input, shape index: {}]   ;;  %s1282_s1 = inlined_call_operand.hbm [shape: f32[8,36], index: 1, kind: input, shape index: {}]   ;;  %s1283_s2 = inlined_call_operand.hbm [shape: f32[3,256], index: 2, kind: input, shape index: {}]   ;;  %s1284_s3 = inlined_call_operand.hbm [shape: f32[2,8,256], index: 3, kind: output, shape index: {}]  }
   0x1   :  { %9 = vsyncpa [#allocation8], 0 }
   0x2   :  { %10 = vsyncpa [#allocation6], 0  ;;  %s930_s12 = smov [#allocation7]   ;;  %s931_s14 = smov [#allocation4]  }
   0x3   :  { %s29_s13 = sshll.u32 %s930_s12, 4  ;;  %s16_s15 = sshll.u32 %s931_s14, 4  ;;  %s30_s13 = int_to_ptr.vmem [resolvable:$true] %s29_s13  ;;  %s966_s15 = int_to_ptr.vmem [resolvable:$true] %s16_s15 }
   0x4   :  { %s836_s18 = scalar_lea.hbm %s1282_s1, 128 }
   0x5   :  { %p837_p0 = scmp.ne.s32.totalorder %s1282_s1, %s836_s18  ;;  %p840_p1 = scmp.lt.u32.totalorder %s836_s18, %s1282_s1 }
   0x7   :  { %p842_p2 = pnand %p840_p1, %p837_p0 }
   0x9   :  { %845 = shalt.err (!%p842_p2)
}
   0xa   :  { %s846_s23 = scalar_lea.vmem %s30_s13, 128  ;;  %p851_p4 = scmp.lt.s32.totalorder %s30_s13, %s30_s13 }
   0xb   :  { %p847_p3 = scmp.ne.s32.totalorder %s30_s13, %s846_s23  ;;  %p852_p5 = scmp.lt.s32.totalorder %s846_s23, %s846_s23 }
   0xd   :  { %p853_p6 = por %p852_p5, %p851_p4 }
   0xf   :  { %p854_p7 = pnand %p853_p6, %p847_p3 }
  0x11   :  { %857 = shalt.err (!%p854_p7)
}
  0x12   :  { %32 = dma.hbm_to_vmem [thread:$0]  %s1282_s1, 128, %s30_s13, [#allocation8]  }
  0x13   :  { %s858_s28 = scalar_lea.hbm %s1281_s0, 256 }
  0x14   :  { %p859_p8 = scmp.ne.s32.totalorder %s1281_s0, %s858_s28  ;;  %p862_p9 = scmp.lt.u32.totalorder %s858_s28, %s1281_s0 }
  0x16   :  { %p864_p10 = pnand %p862_p9, %p859_p8 }
  0x18   :  { %867 = shalt.err (!%p864_p10)
}
  0x19   :  { %s868_s6 = scalar_lea.vmem %s966_s15, 256  ;;  %p873_p12 = scmp.lt.s32.totalorder %s966_s15, %s966_s15 }
  0x1a   :  { %p869_p11 = scmp.ne.s32.totalorder %s966_s15, %s868_s6  ;;  %p874_p13 = scmp.lt.s32.totalorder %s868_s6, %s868_s6 }
  0x1c   :  { %p875_p0 = por %p874_p13, %p873_p12 }
  0x1e   :  { %p876_p1 = pnand %p875_p0, %p869_p11 }
  0x20   :  { %879 = shalt.err (!%p876_p1)
}
  0x21   :  { %s932_s1 = smov 128   ;;  %s933_s7 = smov 8  }
  0x22   :  { %22 = dma.hbm_to_vmem [thread:$0]  %s1281_s0, 256, %s966_s15, [#allocation5], %s932_s1, %s932_s1, %s933_s7  }
  0x23   :  { %s934_s10 = smov [#allocation9]   ;;  %s880_s14 = scalar_lea.hbm %s1283_s2, 128 }
  0x24   :  { %s39_s11 = sshll.u32 %s934_s10, 4  ;;  %p881_p2 = scmp.ne.s32.totalorder %s1283_s2, %s880_s14  ;;  %s40_s11 = int_to_ptr.vmem [resolvable:$true] %s39_s11 }
  0x25   :  { %p884_p3 = scmp.lt.u32.totalorder %s880_s14, %s1283_s2 }
  0x27   :  { %p886_p4 = pnand %p884_p3, %p881_p2 }
  0x29   :  { %889 = shalt.err (!%p886_p4)
}
  0x2a   :  { %s890_s20 = scalar_lea.vmem %s40_s11, 128  ;;  %p895_p6 = scmp.lt.s32.totalorder %s40_s11, %s40_s11 }
  0x2b   :  { %p891_p5 = scmp.ne.s32.totalorder %s40_s11, %s890_s20  ;;  %p896_p7 = scmp.lt.s32.totalorder %s890_s20, %s890_s20 }
  0x2d   :  { %p897_p8 = por %p896_p7, %p895_p6 }
  0x2f   :  { %p898_p9 = pnand %p897_p8, %p891_p5 }
  0x31   :  { %901 = shalt.err (!%p898_p9)
}
  0x32   :  { %42 = dma.hbm_to_vmem [thread:$0]  %s1283_s2, 128, %s40_s11, [#allocation8]  }
  0x33   :  { %924 = dma.done.wait [#allocation5], 256  }
  0x34   :  { %925 = vsyncadd [#allocation5], 4294967040 }
  0x35   :  { %926 = dma.done.wait [#allocation8], 256  }
  0x36   :  { %927 = vsyncadd [#allocation8], 4294967040  ;;  %v62_v0 = vlaneseq  ;;  %vm52_vm0 = vcmask 1044344   ;;  %v935_v1 = vmov 0.0   ;;  %vm54_vm1 = vcmask 134144   ;;  %s936_s2 = smov 111  }
  0x37   :  { %53 = vst.msk [vmem:[#allocation2] sm:$0xf] %vm52_vm0, %v935_v1  ;;  %763 = vmatprep.mubr.f32.mxu1 %v935_v1  ;;  %692 = vmatprep.mubr.f32.mxu0 %v935_v1  ;;  %v60_v5 = vld [vmem:[#allocation9] ss:$4 sm:$0x3]  ;;  %v1027_v29 = vld [vmem:[#allocation4] sm:$0xff] }
  0x38   :  { %v63_v2 = vshrl.u32 %v62_v0, 7  ;;  %55 = vst.msk [vmem:[#allocation2 + $0xc] sm:$0xf] %vm54_vm1, %v935_v1  ;;  %v332_v6 = vld [vmem:[#allocation9] ss:$4 sm:$0x3]  ;;  %v276_v1 = vcombine.low %v1027_v29, %v1027_v29 }
  0x39   :  { %v118_v11 = vld [vmem:[#allocation9 + $0x2] ss:$4 sm:$0x3]  ;;  %v156_v17 = vld [vmem:[#allocation9] ss:$4 sm:$0x3] }
  0x3a   :  { %v1009_v3 = vsub.s32 0, %v63_v2  ;;  %v1011_v4 = vsub.s32 1, %v63_v2  ;;  %v386_v12 = vld [vmem:[#allocation9 + $0x2] ss:$4 sm:$0x3]  ;;  %v1029_v30 = vld [vmem:[#allocation4 + $0x8] sm:$0xff] }
  0x3b   :  { %v422_v18 = vld [vmem:[#allocation9] ss:$4 sm:$0x3]  ;;  %57 = vst [vmem:[#allocation2 + $0x4] sm:$0xff] %v1027_v29  ;;  %197 = vst [vmem:[#allocation3 + $0x40] sm:$0xf] %v1027_v29 }
  0x3c   :  { %v65_v7 = vrot.slane %v60_v5, %v1009_v3  ;;  %v69_v8 = vrot.slane %v60_v5, %v1011_v4  ;;  %v337_v9 = vrot.slane %v332_v6, %v1009_v3  ;;  %v341_v10 = vrot.slane %v332_v6, %v1011_v4  ;;  %v238_v27 = vld [vmem:[#allocation9] ss:$4 sm:$0x3]  ;;  %461 = vst [vmem:[#allocation3 + $0x50] sm:$0xf] %v1029_v30  ;;  %s937_s21 = smov 113  }
  0x3d   :  { %v123_v13 = vrot.slane %v118_v11, %v1009_v3  ;;  %v127_v14 = vrot.slane %v118_v11, %v1011_v4  ;;  %v391_v15 = vrot.slane %v386_v12, %v1009_v3  ;;  %v395_v16 = vrot.slane %v386_v12, %v1011_v4  ;;  %v502_v28 = vld [vmem:[#allocation9] ss:$4 sm:$0x3]  ;;  %v201_v37 = vld [vmem:[#allocation9 + $0x2] ss:$4 sm:$0x3] }
  0x3e   :  { %v70_v19 = vcombine.low %v65_v7, %v69_v8  ;;  %v342_v20 = vcombine.low %v337_v9, %v341_v10  ;;  %v161_v22 = vrot.slane %v156_v17, %v1009_v3  ;;  %v165_v23 = vrot.slane %v156_v17, %v1011_v4  ;;  %v465_v38 = vld [vmem:[#allocation9 + $0x2] ss:$4 sm:$0x3]  ;;  %s938_s22 = smov 127   ;;  %s939_s23 = smov 15  }
  0x3f   :  { %v128_v21 = vcombine.low %v123_v13, %v127_v14  ;;  %v396_v24 = vcombine.low %v391_v15, %v395_v16  ;;  %v427_v25 = vrot.slane %v422_v18, %v1009_v3  ;;  %v431_v26 = vrot.slane %v422_v18, %v1011_v4  ;;  %v293_v43 = vld [vmem:[#allocation9 + $0x2] ss:$4 sm:$0x3]  ;;  %s940_s24 = smov 1   ;;  %s941_s25 = smov 17  }
  0x40   :  { %71 = vrot.lane.b32.xlu0 %v70_v19, %s936_s2  ;;  %343 = vrot.lane.b32.xlu1 %v342_v20, %s936_s2  ;;  %v166_v31 = vcombine.low %v161_v22, %v165_v23  ;;  %v243_v32 = vrot.slane %v238_v27, %v1009_v3  ;;  %v247_v33 = vrot.slane %v238_v27, %v1011_v4  ;;  %v556_v46 = vld [vmem:[#allocation9 + $0x2] ss:$4 sm:$0x3]  ;;  %s942_s26 = smov 16   ;;  %s943_s27 = smov 112   ;;  %vm170_vm2 = vcmask 1039360  }
  0x41   :  { %v432_v34 = vcombine.low %v427_v25, %v431_v26  ;;  %v507_v35 = vrot.slane %v502_v28, %v1009_v3  ;;  %v511_v36 = vrot.slane %v502_v28, %v1011_v4  ;;  %v206_v40 = vrot.slane %v201_v37, %v1009_v3  ;;  %v834_v0 = vld [vmem:[#allocation2 + $0xc] ss:$0 sps:$4 sm:$0xff]   ;;  %s944_s28 = smov [#allocation10]  }
  0x42   :  { %v248_v39 = vcombine.low %v243_v32, %v247_v33  ;;  %v210_v41 = vrot.slane %v201_v37, %v1011_v4  ;;  %v470_v44 = vrot.slane %v465_v38, %v1009_v3  ;;  %v474_v45 = vrot.slane %v465_v38, %v1011_v4  ;;  %v831_v47 = vld [vmem:[#allocation2 + $0x8] ss:$0 sps:$4 sm:$0xff]   ;;  %v1048_v50 = vld [vmem:[#allocation2] sm:$0xff]  ;;  %v835_v2 = vld [vmem:[#allocation2 + $0xc] ss:$0 sps:$4 sm:$0xff]   ;;  %s780_s29 = sshll.u32 %s944_s28, 4  ;;  %s781_s29 = int_to_ptr.vmem [resolvable:$true] %s780_s29 }
  0x43   :  { %v512_v42 = vcombine.low %v507_v35, %v511_v36  ;;  %v116_v48 = vld [vmem:[#allocation2 + $0x8] sm:$0xf]  ;;  %v298_v52 = vrot.slane %v293_v43, %v1009_v3  ;;  %v302_v53 = vrot.slane %v293_v43, %v1011_v4  ;;  %v561_v54 = vrot.slane %v556_v46, %v1009_v3  ;;  %v237_v27 = vld [vmem:[#allocation2 + $0xc] sm:$0xf]  ;;  %s902_s30 = scalar_lea.vmem %s781_s29, 512  ;;  %p907_p11 = scmp.lt.s32.totalorder %s781_s29, %s781_s29 }
  0x44   :  { %129 = vrot.lane.b32.xlu0 %v128_v21, %s937_s21  ;;  %397 = vrot.lane.b32.xlu1 %v396_v24, %s937_s21  ;;  %v1046_v49 = vld [vmem:[#allocation2 + $0x8] sm:$0xf]  ;;  %v211_v55 = vcombine.low %v206_v40, %v210_v41  ;;  %v475_v56 = vcombine.low %v470_v44, %v474_v45  ;;  %v565_v57 = vrot.slane %v556_v46, %v1011_v4  ;;  %vm74_vm3 = vcmask 908288   ;;  %v501_v37 = vld [vmem:[#allocation2 + $0xc] sm:$0xf]  ;;  %p903_p10 = scmp.ne.s32.totalorder %s781_s29, %s902_s30  ;;  %p908_p12 = scmp.lt.s32.totalorder %s902_s30, %s902_s30 }
  0x45   :  { %v59_v51 = vld [vmem:[#allocation2 + $0x8] sm:$0xf]  ;;  %v303_v58 = vcombine.low %v298_v52, %v302_v53  ;;  %v100_v62 = vcombine.low %v1048_v50, %v1048_v50  ;;  %v540_v3 = vcombine.low %v1029_v30, %v1029_v30  ;;  %vm132_vm4 = vcmask 924672   ;;  %v292_v44 = vld [vmem:[#allocation2 + $0xc] sm:$0xf] }
  0x46   :  { %329 = vst [vmem:[#allocation2 + $0x4] sm:$0xff] %v1029_v30  ;;  %v566_v59 = vcombine.low %v561_v54, %v565_v57  ;;  %vm108_vm5 = vcmask 130048   ;;  %vm147_vm6 = vcmask 121856   ;;  %vm186_vm7 = vcmask 7168   ;;  %p909_p13 = por %p908_p12, %p907_p11 }
  0x47   :  { %vm284_vm8 = vcmask 916480   ;;  %vm89_vm9 = vcmask 138240   ;;  %vm615_vm10 = vcmask 1043456   ;;  %vm611_vm11 = vcmask 293888  }
  0x48   :  { %167 = vrot.lane.b32.xlu0 %v166_v31, %s938_s22  ;;  %433 = vrot.lane.b32.xlu1 %v432_v34, %s938_s22  ;;  %p910_p0 = pnand %p909_p13, %p903_p10 }
  0x4c   :  { %249 = vrot.lane.b32.xlu0 %v248_v39, %s939_s23  ;;  %513 = vrot.lane.b32.xlu1 %v512_v42, %s939_s23 }
  0x4d   :  { %v832_v60 = vld [vmem:[#allocation2 + $0x8] ss:$0 sps:$4 sm:$0xff]   ;;  %v1064_v61 = vld [vmem:[#allocation2] sm:$0xff] }
  0x4e   :  { %v370_v63 = vcombine.low %v1064_v61, %v1064_v61  ;;  %v331_v12 = vld [vmem:[#allocation2 + $0x8] sm:$0xf] }
  0x4f   :  { %v385_v20 = vld [vmem:[#allocation2 + $0x8] sm:$0xf] }
  0x50   :  { %212 = vrot.lane.b32.xlu0 %v211_v55, %s940_s24  ;;  %476 = vrot.lane.b32.xlu1 %v475_v56, %s940_s24 }
  0x54   :  { %304 = vrot.lane.b32.xlu0 %v303_v58, %s941_s25  ;;  %567 = vrot.lane.b32.xlu1 %v566_v59, %s941_s25 }
  0x58   :  { %106 = vrot.lane.b32.xlu1 %v831_v47, %s942_s26  ;;  %104 = vrot.lane.b32.xlu0 %v1048_v50, %s942_s26 }
  0x5c   :  { %376 = vrot.lane.b32.xlu1 %v832_v60, %s942_s26  ;;  %374 = vrot.lane.b32.xlu0 %v1064_v61, %s942_s26 }
  0x60   :  { %102 = vrot.lane.b32.xlu1 %v100_v62, %s942_s26  ;;  %280 = vrot.lane.b32.xlu0 %v1027_v29, %s943_s27  ;;  %v195_v62 = vcombine.high %v1027_v29, %v1027_v29 }
  0x62   :  { %198 = vst [vmem:[#allocation3 + $0x48] sm:$0xf] %v195_v62 }
  0x64   :  { %372 = vrot.lane.b32.xlu1 %v370_v63, %s942_s26  ;;  %544 = vrot.lane.b32.xlu0 %v1029_v30, %s943_s27 }
  0x68   :  { %282 = vrot.lane.b32.xlu1 %v834_v0, %s943_s27  ;;  %278 = vrot.lane.b32.xlu0 %v276_v1, %s943_s27  ;;  %v421_v0 = vld [vmem:[#allocation2 + $0x8] sm:$0xf] }
  0x6c   :  { %546 = vrot.lane.b32.xlu1 %v835_v2, %s943_s27 }
  0x70   :  { %542 = vrot.lane.b32.xlu1 %v540_v3, %s943_s27 }
  0xb2   :  { %v72_v4 = vpop.permute.xlu0 %71  ;;  %v344_v5 = vpop.permute.xlu1 %343 }
  0xb3   :  { %v73_v6 = vrot.slane %v72_v4, 4  ;;  %v345_v15 = vrot.slane %v344_v5, 4 }
  0xb5   :  { %v79_v7 = vmul.f32 %v73_v6, %v59_v51  ;;  %v350_v18 = vmul.f32 %v345_v15, %v331_v12  ;;  %v75_v34 = vsel %vm74_vm3, %v73_v6, %v72_v4  ;;  %v459_v6 = vcombine.high %v1029_v30, %v1029_v30 }
  0xb6   :  { %v130_v8 = vpop.permute.xlu0 %129  ;;  %v398_v9 = vpop.permute.xlu1 %397  ;;  %v1116_v38 = vmul.f32 %v75_v34, %v1048_v50 }
  0xb7   :  { %v131_v10 = vrot.slane %v130_v8, 4  ;;  %87 = vrot.lane.b32.xlu1 %v79_v7, %s941_s25  ;;  %v399_v24 = vrot.slane %v398_v9, 4  ;;  %v200_v7 = vld [vmem:[#allocation2 + $0xc] sm:$0xf]  ;;  %462 = vst [vmem:[#allocation3 + $0x58] sm:$0xf] %v459_v6 }
  0xb9   :  { %v137_v11 = vmul.f32 %v131_v10, %v116_v48  ;;  %v404_v28 = vmul.f32 %v399_v24, %v385_v20  ;;  %v133_v41 = vsel %vm132_vm4, %v131_v10, %v130_v8  ;;  %v346_v48 = vsel %vm74_vm3, %v345_v15, %v344_v5  ;;  %v464_v15 = vld [vmem:[#allocation2 + $0xc] sm:$0xf] }
  0xba   :  { %v1082_v13 = vpop.permute.xlu0 %167  ;;  %v1084_v14 = vpop.permute.xlu1 %433  ;;  %v1130_v45 = vmul.f32 %v133_v41, %v1048_v50  ;;  %v400_v56 = vsel %vm132_vm4, %v399_v24, %v398_v9 }
  0xbb   :  { %v169_v16 = vrot.slane %v1082_v13, 4  ;;  %145 = vrot.lane.b32.xlu1 %v137_v11, %s939_s23  ;;  %v435_v17 = vrot.slane %v1084_v14, 4  ;;  %v1156_v63 = vmul.f32 %v400_v56, %v1064_v61 }
  0xbd   :  { %v171_v19 = vsel %vm170_vm2, %v169_v16, %v1082_v13  ;;  %v436_v25 = vsel %vm170_vm2, %v435_v17, %v1084_v14  ;;  %v175_v60 = vmul.f32 %v169_v16, %v1046_v49  ;;  %v440_v49 = vmul.f32 %v435_v17, %v421_v0 }
  0xbe   :  { %v1092_v21 = vmul.f32 %v171_v19, %v1048_v50  ;;  %v250_v22 = vpop.permute.xlu0 %249  ;;  %v1094_v23 = vpop.permute.xlu1 %513  ;;  %v1104_v31 = vmul.f32 %v436_v25, %v1064_v61  ;;  %v1141_v50 = vmul.f32 %v1064_v61, %v346_v48 }
  0xbf   :  { %358 = vrot.lane.b32.xlu1 %v350_v18, %s941_s25  ;;  %v251_v26 = vrot.slane %v250_v22, 4  ;;  %v515_v36 = vrot.slane %v1094_v23, 4  ;;  %v179_v61 = vcombine.low %v175_v60, %v175_v60  ;;  %v444_v14 = vcombine.low %v440_v49, %v440_v49 }
  0xc0   :  { %182 = vrot.lane.b32.xlu0 %v1092_v21, %s940_s24 }
  0xc1   :  { %v256_v35 = vmul.f32 %v251_v26, %v237_v27  ;;  %v520_v42 = vmul.f32 %v515_v36, %v501_v37  ;;  %v252_v53 = vsel %vm147_vm6, %v251_v26, %v250_v22  ;;  %v516_v19 = vsel %vm147_vm6, %v515_v36, %v1094_v23 }
  0xc2   :  { %v1106_v32 = vpop.permute.xlu0 %212  ;;  %v1108_v33 = vpop.permute.xlu1 %476  ;;  %v1145_v57 = vmul.f32 %v252_v53, %v1027_v29  ;;  %v519_v26 = vmul.f32 %v516_v19, %v1029_v30  ;;  %v140_v36 = vcombine.high %v1130_v45, %v1130_v45  ;;  %v443_v37 = vcombine.low %v1104_v31, %v1104_v31 }
  0xc3   :  { %412 = vrot.lane.b32.xlu1 %v404_v28, %s939_s23  ;;  %v214_v58 = vrot.slane %v1106_v32, 4  ;;  %v478_v4 = vrot.slane %v1108_v33, 4 }
  0xc4   :  { %447 = vrot.lane.b32.xlu0 %v1104_v31, %s940_s24  ;;  %v523_v48 = vcombine.high %v519_v26, %v519_v26 }
  0xc5   :  { %v215_v3 = vsel %vm186_vm7, %v214_v58, %v1106_v32  ;;  %v479_v11 = vsel %vm186_vm7, %v478_v4, %v1108_v33  ;;  %v219_v13 = vmul.f32 %v214_v58, %v200_v7  ;;  %v483_v24 = vmul.f32 %v478_v4, %v464_v15 }
  0xc6   :  { %v1118_v39 = vpop.permute.xlu0 %304  ;;  %v1120_v40 = vpop.permute.xlu1 %567  ;;  %v1171_v8 = vmul.f32 %v215_v3, %v1027_v29  ;;  %v482_v16 = vmul.f32 %v479_v11, %v1029_v30  ;;  %v82_v32 = vcombine.high %v1116_v38, %v1116_v38 }
  0xc7   :  { %264 = vrot.lane.b32.xlu1 %v256_v35, %s937_s21  ;;  %v306_v43 = vrot.slane %v1118_v39, 4  ;;  %v223_v25 = vcombine.low %v219_v13, %v219_v13  ;;  %v487_v23 = vcombine.low %v483_v24, %v483_v24  ;;  %v178_v35 = vcombine.low %v1092_v21, %v1092_v21  ;;  %v555_v21 = vld [vmem:[#allocation2 + $0xc] sm:$0xf] }
  0xc8   :  { %83 = vrot.lane.b32.xlu0 %v1116_v38, %s941_s25  ;;  %v353_v38 = vcombine.high %v1141_v50, %v1141_v50  ;;  %v569_v41 = vrot.slane %v1120_v40, 4 }
  0xc9   :  { %v311_v51 = vmul.f32 %v306_v43, %v292_v44  ;;  %v407_v44 = vcombine.high %v1156_v63, %v1156_v63 }
  0xca   :  { %v107_v46 = vpop.permute.xlu1 %106  ;;  %v105_v47 = vpop.permute.xlu0 %104  ;;  %v570_v31 = vsel %vm89_vm9, %v569_v41, %v1120_v40 }
  0xcb   :  { %528 = vrot.lane.b32.xlu1 %v520_v42, %s937_s21  ;;  %v110_v52 = vsel %vm108_vm5, %v105_v47, %v107_v46  ;;  %v486_v42 = vcombine.low %v482_v16, %v482_v16  ;;  %v259_v46 = vcombine.high %v1145_v57, %v1145_v57 }
  0xcc   :  { %141 = vrot.lane.b32.xlu0 %v1130_v45, %s939_s23  ;;  %114 = vst [vmem:[#allocation3 + $0x8] sm:$0xf0] %v110_v52  ;;  %v574_v45 = vmul.f32 %v569_v41, %v555_v21  ;;  %v222_v52 = vcombine.low %v1171_v8, %v1171_v8 }
  0xce   :  { %v377_v54 = vpop.permute.xlu1 %376  ;;  %v375_v55 = vpop.permute.xlu0 %374 }
  0xcf   :  { %319 = vrot.lane.b32.xlu1 %v311_v51, %s936_s2  ;;  %v379_v59 = vsel %vm108_vm5, %v375_v55, %v377_v54  ;;  %v307_v51 = vsel %vm89_vm9, %v306_v43, %v1118_v39 }
  0xd0   :  { %354 = vrot.lane.b32.xlu0 %v1141_v50, %s941_s25  ;;  %383 = vst [vmem:[#allocation3 + $0x18] sm:$0xf0] %v379_v59  ;;  %v310_v40 = vmul.f32 %v307_v51, %v1027_v29 }
  0xd2   :  { %v103_v1 = vpop.permute.xlu1 %102  ;;  %v281_v2 = vpop.permute.xlu0 %280 }
  0xd3   :  { %260 = vrot.lane.b32.xlu1 %v1145_v57, %s937_s21  ;;  %v109_v5 = vsel %vm108_vm5, %v103_v1, %v105_v47  ;;  %v573_v47 = vmul.f32 %v570_v31, %v1029_v30  ;;  %v314_v30 = vcombine.high %v310_v40, %v310_v40 }
  0xd4   :  { %408 = vrot.lane.b32.xlu0 %v1156_v63, %s939_s23  ;;  %113 = vst [vmem:[#allocation3] sm:$0xf0] %v109_v5 }
  0xd5   :  { %v577_v53 = vcombine.high %v573_v47, %v573_v47 }
  0xd6   :  { %v373_v9 = vpop.permute.xlu1 %372  ;;  %v545_v10 = vpop.permute.xlu0 %544 }
  0xd7   :  { %184 = vrot.lane.b32.xlu1 %v179_v61, %s940_s24  ;;  %v378_v12 = vsel %vm108_vm5, %v373_v9, %v375_v55 }
  0xd8   :  { %226 = vrot.lane.b32.xlu0 %v1171_v8, %s938_s22  ;;  %382 = vst [vmem:[#allocation3 + $0x10] sm:$0xf0] %v378_v12 }
  0xda   :  { %v283_v17 = vpop.permute.xlu1 %282  ;;  %v279_v18 = vpop.permute.xlu0 %278 }
  0xdb   :  { %449 = vrot.lane.b32.xlu1 %v444_v14, %s940_s24  ;;  %v286_v20 = vsel %vm284_vm8, %v281_v2, %v283_v17  ;;  %v285_v22 = vsel %vm284_vm8, %v279_v18, %v281_v2 }
  0xdc   :  { %490 = vrot.lane.b32.xlu0 %v482_v16, %s938_s22  ;;  %290 = vst [vmem:[#allocation3 + $0x68] sm:$0xf0] %v286_v20  ;;  %289 = vst [vmem:[#allocation3 + $0x60] sm:$0xf0] %v285_v22 }
  0xde   :  { %v547_v27 = vpop.permute.xlu1 %546 }
  0xdf   :  { %228 = vrot.lane.b32.xlu1 %v223_v25, %s938_s22  ;;  %v549_v28 = vsel %vm284_vm8, %v545_v10, %v547_v27 }
  0xe0   :  { %524 = vrot.lane.b32.xlu0 %v519_v26, %s937_s21  ;;  %553 = vst [vmem:[#allocation3 + $0x78] sm:$0xf0] %v549_v28 }
  0xe2   :  { %v543_v33 = vpop.permute.xlu1 %542 }
  0xe3   :  { %492 = vrot.lane.b32.xlu1 %v487_v23, %s938_s22  ;;  %v548_v34 = vsel %vm284_vm8, %v543_v33, %v545_v10 }
  0xe4   :  { %85 = vrot.lane.b32.xlu0 %v82_v32, %s941_s25  ;;  %552 = vst [vmem:[#allocation3 + $0x70] sm:$0xf0] %v548_v34 }
  0xe7   :  { %180 = vrot.lane.b32.xlu1 %v178_v35, %s940_s24 }
  0xe8   :  { %143 = vrot.lane.b32.xlu0 %v140_v36, %s939_s23 }
  0xeb   :  { %445 = vrot.lane.b32.xlu1 %v443_v37, %s940_s24 }
  0xec   :  { %356 = vrot.lane.b32.xlu0 %v353_v38, %s941_s25 }
  0xef   :  { %488 = vrot.lane.b32.xlu1 %v486_v42, %s938_s22 }
  0xf0   :  { %410 = vrot.lane.b32.xlu0 %v407_v44, %s939_s23 }
  0xf3   :  { %582 = vrot.lane.b32.xlu1 %v574_v45, %s936_s2 }
  0xf4   :  { %262 = vrot.lane.b32.xlu0 %v259_v46, %s937_s21 }
  0xf7   :  { %578 = vrot.lane.b32.xlu1 %v573_v47, %s936_s2 }
  0xf8   :  { %526 = vrot.lane.b32.xlu0 %v523_v48, %s937_s21 }
  0xfc   :  { %224 = vrot.lane.b32.xlu0 %v222_v52, %s938_s22 }
 0x100   :  { %317 = vrot.lane.b32.xlu0 %v314_v30, %s936_s2 }
 0x104   :  { %580 = vrot.lane.b32.xlu0 %v577_v53, %s936_s2 }
 0x108   :  { %315 = vrot.lane.b32.xlu0 %v310_v40, %s936_s2 }
 0x129   :  { %v88_v39 = vpop.permute.xlu1 %87 }
 0x12d   :  { %v146_v43 = vpop.permute.xlu1 %145 }
 0x131   :  { %v359_v50 = vpop.permute.xlu1 %358 }
 0x132   :  { %v183_v54 = vpop.permute.xlu0 %182 }
 0x135   :  { %v413_v55 = vpop.permute.xlu1 %412 }
 0x136   :  { %v448_v56 = vpop.permute.xlu0 %447 }
 0x139   :  { %v265_v29 = vpop.permute.xlu1 %264 }
 0x13a   :  { %v84_v57 = vpop.permute.xlu0 %83 }
 0x13d   :  { %v1234_v58 = vpop.permute.xlu1 %528 }
 0x13e   :  { %v142_v59 = vpop.permute.xlu0 %141 }
 0x141   :  { %v1236_v60 = vpop.permute.xlu1 %319 }
 0x142   :  { %v355_v62 = vpop.permute.xlu0 %354 }
 0x145   :  { %v261_v63 = vpop.permute.xlu1 %260 }
 0x146   :  { %v409_v0 = vpop.permute.xlu0 %408 }
 0x149   :  { %v185_v1 = vpop.permute.xlu1 %184 }
 0x14a   :  { %v188_v2 = vsel %vm186_vm7, %v183_v54, %v185_v1  ;;  %v1239_v3 = vpop.permute.xlu0 %226 }
 0x14b   :  { %192 = vst [vmem:[#allocation3 + $0x28] sm:$0xf0] %v188_v2 }
 0x14d   :  { %v450_v4 = vpop.permute.xlu1 %449 }
 0x14e   :  { %v452_v5 = vsel %vm186_vm7, %v448_v56, %v450_v4  ;;  %v491_v49 = vpop.permute.xlu0 %490 }
 0x14f   :  { %456 = vst [vmem:[#allocation3 + $0x38] sm:$0xf0] %v452_v5 }
 0x151   :  { %v229_v61 = vpop.permute.xlu1 %228 }
 0x152   :  { %v231_v6 = vsel %vm170_vm2, %v1239_v3, %v229_v61  ;;  %v525_v7 = vpop.permute.xlu0 %524 }
 0x153   :  { %235 = vst [vmem:[#allocation3 + $0x48] sm:$0xf0] %v231_v6 }
 0x155   :  { %v493_v8 = vpop.permute.xlu1 %492 }
 0x156   :  { %v495_v9 = vsel %vm170_vm2, %v491_v49, %v493_v8  ;;  %v86_v10 = vpop.permute.xlu0 %85  ;;  %v590_v8 = vld [vmem:[#allocation7] sm:$0xff] }
 0x157   :  { %499 = vst [vmem:[#allocation3 + $0x58] sm:$0xf0] %v495_v9  ;;  %v90_v11 = vsel %vm89_vm9, %v84_v57, %v86_v10  ;;  %v91_v12 = vsel %vm89_vm9, %v86_v10, %v88_v39 }
 0x158   :  { %94 = vst [vmem:[#allocation3] sm:$0xf] %v90_v11  ;;  %95 = vst [vmem:[#allocation3 + $0x8] sm:$0xf] %v91_v12 }
 0x159   :  { %v181_v13 = vpop.permute.xlu1 %180 }
 0x15a   :  { %v187_v14 = vsel %vm186_vm7, %v181_v13, %v183_v54  ;;  %v144_v15 = vpop.permute.xlu0 %143  ;;  %v600_v53 = vld [vmem:[#allocation3 + $0x48] sm:$0xff] }
 0x15b   :  { %191 = vst [vmem:[#allocation3 + $0x20] sm:$0xf0] %v187_v14  ;;  %v148_v16 = vsel %vm147_vm6, %v142_v59, %v144_v15  ;;  %v149_v17 = vsel %vm147_vm6, %v144_v15, %v146_v43 }
 0x15c   :  { %152 = vst [vmem:[#allocation3 + $0x20] sm:$0xf] %v148_v16  ;;  %153 = vst [vmem:[#allocation3 + $0x28] sm:$0xf] %v149_v17 }
 0x15d   :  { %v446_v18 = vpop.permute.xlu1 %445 }
 0x15e   :  { %v451_v19 = vsel %vm186_vm7, %v446_v18, %v448_v56  ;;  %v357_v20 = vpop.permute.xlu0 %356 }
 0x15f   :  { %455 = vst [vmem:[#allocation3 + $0x30] sm:$0xf0] %v451_v19  ;;  %v360_v22 = vsel %vm89_vm9, %v355_v62, %v357_v20  ;;  %v361_v24 = vsel %vm89_vm9, %v357_v20, %v359_v50  ;;  %v592_v28 = vld [vmem:[#allocation3 + $0x8] sm:$0xff]  ;;  %v591_v34 = vld [vmem:[#allocation3] sm:$0xff] }
 0x160   :  { %364 = vst [vmem:[#allocation3 + $0x10] sm:$0xf] %v360_v22  ;;  %365 = vst [vmem:[#allocation3 + $0x18] sm:$0xf] %v361_v24 }
 0x161   :  { %v489_v25 = vpop.permute.xlu1 %488 }
 0x162   :  { %v494_v26 = vsel %vm170_vm2, %v489_v25, %v491_v49  ;;  %v411_v27 = vpop.permute.xlu0 %410 }
 0x163   :  { %498 = vst [vmem:[#allocation3 + $0x50] sm:$0xf0] %v494_v26  ;;  %v414_v23 = vsel %vm147_vm6, %v409_v0, %v411_v27  ;;  %v415_v32 = vsel %vm147_vm6, %v411_v27, %v413_v55  ;;  %v596_v33 = vld [vmem:[#allocation3 + $0x28] sm:$0xff]  ;;  %v595_v35 = vld [vmem:[#allocation3 + $0x20] sm:$0xff]  ;;  %v602_v55 = vld [vmem:[#allocation3 + $0x58] sm:$0xff] }
 0x164   :  { %418 = vst [vmem:[#allocation3 + $0x30] sm:$0xf] %v414_v23  ;;  %419 = vst [vmem:[#allocation3 + $0x38] sm:$0xf] %v415_v32  ;;  %v799_v36 = vpack.c.bf16 %v596_v33, %v592_v28  ;;  %v801_v37 = vpack.c.bf16 %v595_v35, %v591_v34 }
 0x165   :  { %v583_v43 = vpop.permute.xlu1 %582 }
 0x166   :  { %800 = vmatprep.subr.bf16.mxu0 %v799_v36  ;;  %v263_v38 = vpop.permute.xlu0 %262 }
 0x167   :  { %v266_v41 = vsel %vm132_vm4, %v261_v63, %v263_v38  ;;  %v267_v21 = vsel %vm132_vm4, %v263_v38, %v265_v29  ;;  %802 = vmatpush1.bf16.msra.mxu0 %v801_v37  ;;  %v594_v44 = vld [vmem:[#allocation3 + $0x18] sm:$0xff]  ;;  %v593_v47 = vld [vmem:[#allocation3 + $0x10] sm:$0xff] }
 0x168   :  { %270 = vst [vmem:[#allocation3 + $0x60] sm:$0xf] %v266_v41  ;;  %271 = vst [vmem:[#allocation3 + $0x68] sm:$0xf] %v267_v21 }
 0x169   :  { %v579_v63 = vpop.permute.xlu1 %578 }
 0x16a   :  { %v527_v42 = vpop.permute.xlu0 %526  ;;  %v601_v57 = vld [vmem:[#allocation3 + $0x50] sm:$0xff] }
 0x16b   :  { %v530_v45 = vsel %vm132_vm4, %v525_v7, %v527_v42  ;;  %v531_v31 = vsel %vm132_vm4, %v527_v42, %v1234_v58  ;;  %v598_v46 = vld [vmem:[#allocation3 + $0x38] sm:$0xff]  ;;  %v597_v48 = vld [vmem:[#allocation3 + $0x30] sm:$0xff] }
 0x16c   :  { %534 = vst [vmem:[#allocation3 + $0x70] sm:$0xf] %v530_v45  ;;  %535 = vst [vmem:[#allocation3 + $0x78] sm:$0xf] %v531_v31  ;;  %v807_v51 = vpack.c.bf16 %v598_v46, %v594_v44  ;;  %v809_v40 = vpack.c.bf16 %v597_v48, %v593_v47 }
 0x16e   :  { %808 = vmatprep.subr.bf16.mxu1 %v807_v51  ;;  %v225_v52 = vpop.permute.xlu0 %224 }
 0x16f   :  { %v230_v30 = vsel %vm170_vm2, %v225_v52, %v1239_v3  ;;  %810 = vmatpush1.bf16.msra.mxu1 %v809_v40  ;;  %v604_v39 = vld [vmem:[#allocation3 + $0x68] sm:$0xff]  ;;  %v603_v4 = vld [vmem:[#allocation3 + $0x60] sm:$0xff] }
 0x170   :  { %234 = vst [vmem:[#allocation3 + $0x40] sm:$0xf0] %v230_v30  ;;  %v803_v50 = vpack.c.bf16 %v604_v39, %v600_v53 }
 0x172   :  { %804 = vmatprep.subr.bf16.mxu0 %v803_v50  ;;  %v318_v54 = vpop.permute.xlu0 %317 }
 0x173   :  { %v322_v56 = vsel %vm74_vm3, %v318_v54, %v1236_v60  ;;  %v606_v29 = vld [vmem:[#allocation3 + $0x78] sm:$0xff]  ;;  %v605_v58 = vld [vmem:[#allocation3 + $0x70] sm:$0xff] }
 0x174   :  { %326 = vst [vmem:[#allocation3 + $0x88] sm:$0xf] %v322_v56  ;;  %v811_v59 = vpack.c.bf16 %v606_v29, %v602_v55  ;;  %v813_v62 = vpack.c.bf16 %v605_v58, %v601_v57 }
 0x176   :  { %812 = vmatprep.subr.bf16.mxu1 %v811_v59  ;;  %v581_v0 = vpop.permute.xlu0 %580 }
 0x177   :  { %v584_v1 = vsel %vm74_vm3, %v579_v63, %v581_v0  ;;  %v585_v2 = vsel %vm74_vm3, %v581_v0, %v583_v43  ;;  %814 = vmatpush1.bf16.msra.mxu1 %v813_v62  ;;  %v599_v3 = vld [vmem:[#allocation3 + $0x40] sm:$0xff] }
 0x178   :  { %588 = vst [vmem:[#allocation3 + $0x90] sm:$0xf] %v584_v1  ;;  %589 = vst [vmem:[#allocation3 + $0x98] sm:$0xf] %v585_v2  ;;  %v805_v5 = vpack.c.bf16 %v603_v4, %v599_v3 }
 0x17a   :  { %806 = vmatpush1.bf16.msra.mxu0 %v805_v5  ;;  %v316_v60 = vpop.permute.xlu0 %315 }
 0x17b   :  { %v321_v49 = vsel %vm74_vm3, %v316_v60, %v318_v54  ;;  %v608_v61 = vld [vmem:[#allocation3 + $0x88] sm:$0xf] }
 0x17c   :  { %325 = vst [vmem:[#allocation3 + $0x80] sm:$0xf] %v321_v49  ;;  %793 = vmatprep.subr.msk.mxu0 %vm615_vm10, %v608_v61 }
 0x17f   :  { %v610_v6 = vld [vmem:[#allocation3 + $0x98] sm:$0xf]  ;;  %v609_v7 = vld [vmem:[#allocation3 + $0x90] sm:$0xf] }
 0x180   :  { %796 = vmatprep.subr.msk.mxu1 %vm615_vm10, %v610_v6 }
 0x181   :  { %797 = vmatpush1.msk.msra.mxu1 %vm615_vm10, %v609_v7 }
 0x182   :  { %798 = vmatmul.mubr.msk.f32.vlgmr.msra.gmra.mrb[0].mxu1 %vm611_vm11, %v590_v8 }
 0x183   :  { %v607_v9 = vld [vmem:[#allocation3 + $0x80] sm:$0xf] }
 0x184   :  { %794 = vmatpush1.msk.msra.mxu0 %vm615_vm10, %v607_v9 }
 0x185   :  { %795 = vmatmul.mubr.msk.f32.vlgmr.msra.gmra.mrb[0].mxu0 %vm611_vm11, %v590_v8 }
 0x255   :  { %v765_v10 = vpop.f32.mrb[0].mxu1 }
 0x256   :  { %773 = vst [vmem:[#allocation10 + $0x10] sm:$0xff] %v765_v10  ;;  %v767_v11 = vpop.f32.mrb[1].mxu1 }
 0x257   :  { %774 = vst [vmem:[#allocation10 + $0x18] sm:$0xff] %v767_v11 }
 0x258   :  { %v694_v12 = vpop.f32.mrb[0].mxu0 }
 0x259   :  { %770 = vst [vmem:[#allocation10] sm:$0xff] %v694_v12  ;;  %v696_v13 = vpop.f32.mrb[1].mxu0 }
 0x25a   :  { %771 = vst [vmem:[#allocation10 + $0x8] sm:$0xff] %v696_v13 }
 0x25b   :  { %913 = shalt.err (!%p910_p0)
}
 0x25c   :  { %s914_s6 = scalar_lea.hbm %s1284_s3, 512 }
 0x25d   :  { %p915_p1 = scmp.ne.s32.totalorder %s1284_s3, %s914_s6  ;;  %p918_p2 = scmp.lt.u32.totalorder %s914_s6, %s1284_s3 }
 0x25f   :  { %p920_p3 = pnand %p918_p2, %p915_p1 }
 0x261   :  { %923 = shalt.err (!%p920_p3)
}
 0x262   :  { %s945_s10 = smov 256  }
 0x263   :  { %786 = dma.vmem_to_hbm [thread:$0]  %s781_s29, 512, %s1284_s3, [#allocation6], %s945_s10, %s945_s10, %s942_s26  }
 0x264   :  { %928 = dma.done.wait [#allocation6], 512  }
 0x265   :  { %929 = vsyncadd [#allocation6], 4294966784 }
 0x266   :  { %790 = vsyncpa [#allocation5], 1 }
 0x267   :  { %791 = vsyncpa [#allocation8], 1 }
 0x268   :  { %792 = vsyncpa [#allocation6], 1 }

</bundles_post_ra>
